<compile_context>
chip_gen: v5e
topology: v5e:2x2
jax: 0.10.0
libtpu: 0.0.40
codegen_flags: <defaults>
</compile_context>

<pallas_src>
import functools

import jax
import jax.numpy as jnp
from jax.experimental import pallas as pl
from jax.experimental.pallas import tpu as pltpu


def _round_up(x, m):
    return ((x + m - 1) // m) * m


def _pick_tile_k(d_in, tile_k_max):
    """K tile for fc6: multiple of 128 (or the full dim) that, when possible,
    divides d_in exactly so the activation needs no K padding."""
    if d_in <= tile_k_max:
        return d_in, d_in
    start = tile_k_max - (tile_k_max % 128)
    for tk in range(start, 0, -128):
        if d_in % tk == 0:
            return tk, d_in
    tk = start
    return tk, _round_up(d_in, tk)


def _pick_h7_tile(h_pad, tile_max):
    """Largest multiple-of-128 divisor of h_pad that is <= tile_max."""
    if h_pad <= tile_max:
        return h_pad
    best = 128
    t = 128
    while t <= tile_max:
        if h_pad % t == 0:
            best = t
        t += 128
    return best


def _default_tiling():
    """Chip-aware (tile_n, vmem_limit_bytes) defaults.

    v5e/v6e (128 MiB VMEM): large row tile + ~100 MiB scoped limit.
    v7x-class (64 MiB VMEM) or unknown: moderate tile, headroom below 64 MiB.
    """
    vmem = 64 * 1024 * 1024
    try:
        info = pltpu.get_tpu_info()
        vmem = getattr(info, "vmem_capacity_bytes", vmem) or vmem
    except Exception:
        pass
    if vmem >= 96 * 1024 * 1024:
        return 768, 100 * 1024 * 1024
    return 448, 52 * 1024 * 1024


# ----------------------------- Pallas kernel ------------------------------ #

def _rel_mlp_kernel(pooled_ref, w6_ref, b6_ref, b7_ref, wp_ref, bp_ref, w7_hbm,
                    x_out_ref, logits_ref,
                    acc_ref, w7_buf, w7_sem, *, n_blk7, tile_h7):
    """Fused FC6(ReLU) -> FC7(ReLU) -> predictor.

    Grid = (row tiles, fc6 K blocks). acc_ref holds the f32 fc6 partials and
    is reused as the fc7 accumulator in the epilogue.  w7 is streamed from
    HBM in (tile_h7, h_pad) chunks through a manual double buffer.
    """
    k = pl.program_id(1)
    nk = pl.num_programs(1)

    @pl.when(k == 0)
    def _():
        acc_ref[...] = jnp.zeros_like(acc_ref)

    # bf16 x bf16 -> f32 accumulate on the MXU.
    acc_ref[...] += jnp.dot(pooled_ref[...], w6_ref[...],
                            preferred_element_type=jnp.float32)

    @pl.when(k == nk - 1)
    def _():
        def start_w7(blk, slot):
            pltpu.make_async_copy(
                w7_hbm.at[pl.ds(blk * tile_h7, tile_h7), :],
                w7_buf.at[slot], w7_sem.at[slot]).start()

        def wait_w7(slot):
            # Wait descriptor only needs matching shape + semaphore.
            pltpu.make_async_copy(
                w7_hbm.at[pl.ds(0, tile_h7), :],
                w7_buf.at[slot], w7_sem.at[slot]).wait()

        # Kick off the first w7 chunk before doing the fc6 epilogue math.
        start_w7(0, 0)

        # Bias + ReLU in f32 (no bf16 VPU on v5e); bf16 only at MXU inputs.
        h = jnp.maximum(acc_ref[...] + b6_ref[...], 0.0)
        h_bf = h.astype(jnp.bfloat16)

        # Reuse acc_ref as the fc7 accumulator (h has already been read).
        acc_ref[...] = jnp.zeros_like(acc_ref)

        # Static unrolled double-buffered stream over w7's row blocks.
        for b in range(n_blk7):
            slot = b & 1
            wait_w7(slot)
            if b + 1 < n_blk7:
                start_w7(b + 1, 1 - slot)
            acc_ref[...] += jnp.dot(
                h_bf[:, b * tile_h7:(b + 1) * tile_h7], w7_buf[slot],
                preferred_element_type=jnp.float32)

        h2 = jnp.maximum(acc_ref[...] + b7_ref[...], 0.0)
        x_out_ref[...] = h2.astype(x_out_ref.dtype)
        logits_ref[...] = (jnp.dot(h2.astype(jnp.bfloat16), wp_ref[...],
                                   preferred_element_type=jnp.float32)
                           + bp_ref[...])


# --------------------------- Weight pre-packing ---------------------------- #

def _permute_w6_rows(w6, channels, pool_size):
    """Permute fc6 rows from PyTorch's (c, py, px)-major flattening to the
    (py, px, c)-major layout produced by the transpose-free ROI gather."""
    hidden = w6.shape[1]
    return (w6.reshape(channels, pool_size, pool_size, hidden)
              .transpose(1, 2, 0, 3)
              .reshape(pool_size * pool_size * channels, hidden))


def pack_rel_mlp_params(params, channels, pool_size, *, tile_k_max=2048):
    """One-time cast / pad / permute of the MLP weights, hoisted out of the
    per-forward path (padding + bf16 cast of w6/w7/wp is expensive at
    production sizes if repeated every call)."""
    w6, b6 = params["w6"], params["b6"]
    w7, b7 = params["w7"], params["b7"]
    wp, bp = params["wp"], params["bp"]
    d_in, hidden = w6.shape
    n_rel = wp.shape[1]
    assert d_in == channels * pool_size * pool_size

    h_pad = _round_up(hidden, 128)
    r_pad = _round_up(n_rel, 128)
    tile_k, d_pad = _pick_tile_k(d_in, tile_k_max)

    w6p = _permute_w6_rows(w6, channels, pool_size)

    return {
        "w6": jnp.pad(w6p.astype(jnp.bfloat16),
                      ((0, d_pad - d_in), (0, h_pad - hidden))),
        "w7": jnp.pad(w7.astype(jnp.bfloat16),
                      ((0, h_pad - hidden), (0, h_pad - hidden))),
        "wp": jnp.pad(wp.astype(jnp.bfloat16),
                      ((0, h_pad - hidden), (0, r_pad - n_rel))),
        "b6": jnp.pad(b6.astype(jnp.float32), (0, h_pad - hidden)).reshape(1, h_pad),
        "b7": jnp.pad(b7.astype(jnp.float32), (0, h_pad - hidden)).reshape(1, h_pad),
        "bp": jnp.pad(bp.astype(jnp.float32), (0, r_pad - n_rel)).reshape(1, r_pad),
        "d_in": d_in, "d_pad": d_pad, "tile_k": tile_k,
        "hidden": hidden, "n_rel": n_rel, "h_pad": h_pad, "r_pad": r_pad,
    }


# ------------------------------ Kernel wrapper ----------------------------- #

def rel_mlp_pallas(pooled, packed, *, tile_n=None, vmem_limit_bytes=None,
                   tile_h7_max=1024):
    """pooled: (N, D_in) bf16/f32. Returns (x: (N, H) bf16, logits: (N, R) f32)."""
    n = pooled.shape[0]
    d_in, d_pad, tile_k = packed["d_in"], packed["d_pad"], packed["tile_k"]
    hidden, n_rel = packed["hidden"], packed["n_rel"]
    h_pad, r_pad = packed["h_pad"], packed["r_pad"]

    dflt_tile_n, dflt_vmem = _default_tiling()
    tile_n = dflt_tile_n if tile_n is None else tile_n
    vmem_limit_bytes = dflt_vmem if vmem_limit_bytes is None else vmem_limit_bytes

    pooled_b = pooled.astype(jnp.bfloat16)
    if d_pad != d_in:
        pooled_b = jnp.pad(pooled_b, ((0, 0), (0, d_pad - d_in)))

    # Clamp the row tile for tiny inputs (keep sublane multiple of 8); no
    # explicit row padding -- Pallas masks the ragged last row tile.
    tile_n_eff = min(tile_n, _round_up(n, 8))
    tile_h7 = _pick_h7_tile(h_pad, tile_h7_max)
    n_blk7 = h_pad // tile_h7
    grid = (pl.cdiv(n, tile_n_eff), d_pad // tile_k)

    kernel = functools.partial(_rel_mlp_kernel, n_blk7=n_blk7, tile_h7=tile_h7)
    const1 = pl.Buffered(1)   # single-buffer constant-index operands

    x_out, logits = pl.pallas_call(
        kernel,
        out_shape=(
            jax.ShapeDtypeStruct((n, h_pad), jnp.bfloat16),   # bf16 writeback
            jax.ShapeDtypeStruct((n, r_pad), jnp.float32),
        ),
        grid_spec=pltpu.PrefetchScalarGridSpec(
            num_scalar_prefetch=0,
            grid=grid,
            in_specs=[
                # Streamed (default double buffering).  TODO(synk): sweep
                # pipeline_mode=pl.Buffered(3) here once VMEM headroom allows.
                pl.BlockSpec((tile_n_eff, tile_k), lambda i, k: (i, k)),
                pl.BlockSpec((tile_k, h_pad), lambda i, k: (k, 0)),
                # Constants: single-buffered.
                pl.BlockSpec((1, h_pad), lambda i, k: (0, 0), pipeline_mode=const1),
                pl.BlockSpec((1, h_pad), lambda i, k: (0, 0), pipeline_mode=const1),
                pl.BlockSpec((h_pad, r_pad), lambda i, k: (0, 0), pipeline_mode=const1),
                pl.BlockSpec((1, r_pad), lambda i, k: (0, 0), pipeline_mode=const1),
                # fc7 weight stays in HBM; streamed manually in the epilogue.
                pl.BlockSpec(memory_space=pl.ANY),
            ],
            out_specs=[
                pl.BlockSpec((tile_n_eff, h_pad), lambda i, k: (i, 0)),
                pl.BlockSpec((tile_n_eff, r_pad), lambda i, k: (i, 0)),
            ],
            scratch_shapes=[
                pltpu.VMEM((tile_n_eff, h_pad), jnp.float32),    # fc6/fc7 acc
                pltpu.VMEM((2, tile_h7, h_pad), jnp.bfloat16),   # w7 chunks
                pltpu.SemaphoreType.DMA((2,)),
            ],
        ),
        compiler_params=pltpu.CompilerParams(
            dimension_semantics=("parallel", "arbitrary"),
            vmem_limit_bytes=vmem_limit_bytes),
    )(pooled_b, packed["w6"], packed["b6"], packed["b7"],
      packed["wp"], packed["bp"], packed["w7"])

    x = x_out if h_pad == hidden else x_out[:, :hidden]
    lg = logits if r_pad == n_rel else logits[:, :n_rel]
    return x, lg


# ------------------------------ JAX glue ---------------------------------- #

def _roi_align_image(fmap, boxes, pool_size):
    """Vectorized ROI-align (sampling_ratio=1) of all boxes on one NCHW map.

    fmap: (C, H, W); boxes: (n, 4) as (x1, y1, x2, y2) in feature-map coords.
    Returns (n, P*P*C) flattened (py, px, c)-major: the feature map is laid
    out (H*W, C) once so every bilinear gather is a cheap major-axis row
    gather and no cross-lane transpose of the gathered data is needed.
    """
    # TODO(synk): maskrcnn_benchmark's ROIAlign also applies spatial_scale,
    # an aligned=True half-pixel offset and configurable sampling_ratio; this
    # keeps the simplified semantics of the original JAX glue.
    c, h, w = fmap.shape
    n = boxes.shape[0]
    flat = jnp.transpose(fmap, (1, 2, 0)).reshape(h * w, c)       # (H*W, C)

    x1, y1, x2, y2 = boxes[:, 0], boxes[:, 1], boxes[:, 2], boxes[:, 3]
    roi_w = jnp.maximum(x2 - x1, 1.0)
    roi_h = jnp.maximum(y2 - y1, 1.0)
    bin_w = roi_w / pool_size
    bin_h = roi_h / pool_size
    centers = jnp.arange(pool_size, dtype=jnp.float32) + 0.5
    ys = y1[:, None] + centers[None, :] * bin_h[:, None]          # (n, P)
    xs = x1[:, None] + centers[None, :] * bin_w[:, None]          # (n, P)
    yy = jnp.broadcast_to(ys[:, :, None], (n, pool_size, pool_size))
    xx = jnp.broadcast_to(xs[:, None, :], (n, pool_size, pool_size))

    y0 = jnp.floor(yy)
    x0 = jnp.floor(xx)
    ly = yy - y0
    lx = xx - x0
    y0i = jnp.clip(y0.astype(jnp.int32), 0, h - 1)
    y1i = jnp.clip(y0i + 1, 0, h - 1)
    x0i = jnp.clip(x0.astype(jnp.int32), 0, w - 1)
    x1i = jnp.clip(x0i + 1, 0, w - 1)

    def gather(yi, xi):
        idx = (yi * w + xi).reshape(-1)                            # (n*P*P,)
        return jnp.take(flat, idx, axis=0)                         # (n*P*P, C)

    v00 = gather(y0i, x0i)
    v01 = gather(y0i, x1i)
    v10 = gather(y1i, x0i)
    v11 = gather(y1i, x1i)
    w00 = ((1.0 - ly) * (1.0 - lx)).reshape(-1, 1)
    w01 = ((1.0 - ly) * lx).reshape(-1, 1)
    w10 = (ly * (1.0 - lx)).reshape(-1, 1)
    w11 = (ly * lx).reshape(-1, 1)
    vals = v00 * w00 + v01 * w01 + v10 * w10 + v11 * w11           # (n*P*P, C)
    return vals.reshape(n, pool_size * pool_size * c)              # (n, P*P*C)


def union_box_roi_features(features, boxes_per_image, pair_idxs_per_image,
                           pool_size, out_dtype=jnp.bfloat16):
    """Pool ROI-aligned features of union boxes for each relation pair.

    features: (B, C, H, W) single-level feature map (NCHW).
    Returns pooled (N_total_pairs, P*P*C) in `out_dtype` and rel_inds with
    proposal indices offset across images, as in the original extractor.
    """
    pooled_list, rel_inds_list = [], []
    offset = 0
    for img_idx, (boxes, pairs) in enumerate(
            zip(boxes_per_image, pair_idxs_per_image)):
        fmap = features[img_idx]                                   # (C, H, W)
        head_boxes = boxes[pairs[:, 0]]
        tail_boxes = boxes[pairs[:, 1]]
        union = jnp.concatenate(
            [jnp.minimum(head_boxes[:, :2], tail_boxes[:, :2]),
             jnp.maximum(head_boxes[:, 2:], tail_boxes[:, 2:])], axis=1)
        pooled = _roi_align_image(fmap, union, pool_size).astype(out_dtype)
        pooled_list.append(pooled)
        rel_inds_list.append(pairs + offset)
        offset += boxes.shape[0]
    return (jnp.concatenate(pooled_list, axis=0),
            jnp.concatenate(rel_inds_list, axis=0))


def baseline_forward(features, proposals_boxes, proposals_labels,
                     proposal_pairs, packed_params, pool_size):
    """Mirrors Baseline.forward (inference path).

    Returns (x, obj_class_logits, rel_class_logits, obj_class_labels, rel_inds).
    """
    pooled, rel_inds = union_box_roi_features(
        features, proposals_boxes, proposal_pairs, pool_size)

    x, rel_class_logits = rel_mlp_pallas(pooled, packed_params)

    obj_class_logits = None  # Baseline never computes obj_class_logits.
    obj_class_labels = jnp.concatenate(proposals_labels, axis=0)
    return x, obj_class_logits, rel_class_logits, obj_class_labels, rel_inds


# ------------------------------- Demo / test ------------------------------- #

if __name__ == "__main__":
    key = jax.random.PRNGKey(0)
    B, C, H, W = 2, 4, 16, 16          # NCHW features (single FPN level)
    POOL = 4                           # ROI pooler resolution
    HIDDEN = 32                        # MLP representation size
    NUM_REL_CLASSES = 8                # relation predictor output classes
    NUM_PROPS = (5, 6)                 # proposals per image
    NUM_PAIRS = (6, 10)                # relation pairs per image

    keys = jax.random.split(key, 12)

    # Feature maps (NCHW).
    features = jax.random.normal(keys[0], (B, C, H, W), dtype=jnp.float32)

    # Proposal boxes in feature-map coordinates (x1, y1, x2, y2) and labels.
    proposals_boxes, proposals_labels, proposal_pairs = [], [], []
    for i in range(B):
        kb, kl, kp = jax.random.split(keys[1 + i], 3)
        pts = jax.random.uniform(kb, (NUM_PROPS[i], 2, 2),
                                 minval=0.0, maxval=float(H - 1))
        lo = jnp.min(pts, axis=1)
        hi = jnp.max(pts, axis=1) + 1.0
        proposals_boxes.append(jnp.concatenate([lo, hi], axis=1))  # (n, 4)
        proposals_labels.append(
            jax.random.randint(kl, (NUM_PROPS[i],), 1, 11, dtype=jnp.int32))
        proposal_pairs.append(
            jax.random.randint(kp, (NUM_PAIRS[i], 2), 0, NUM_PROPS[i],
                               dtype=jnp.int32))

    # Deterministic parameter init (fc6, fc7, relation predictor).
    d_in = C * POOL * POOL
    params = {
        "w6": 0.05 * jax.random.normal(keys[4], (d_in, HIDDEN), jnp.float32),
        "b6": 0.01 * jnp.ones((HIDDEN,), jnp.float32),
        "w7": 0.05 * jax.random.normal(keys[5], (HIDDEN, HIDDEN), jnp.float32),
        "b7": 0.01 * jnp.ones((HIDDEN,), jnp.float32),
        "wp": 0.05 * jax.random.normal(keys[6], (HIDDEN, NUM_REL_CLASSES),
                                       jnp.float32),
        "bp": jnp.zeros((NUM_REL_CLASSES,), jnp.float32),
    }

    # One-time weight packing (hoisted out of the per-forward path).
    packed = pack_rel_mlp_params(params, C, POOL)

    # TODO(synk): obj_class_logits branch (obj_class_logits[:,1:].max(1)[1]+1)
    # is dead in Baseline (always None), so only the labels-concat path exists.
    x, obj_logits, rel_logits, obj_labels, rel_inds = baseline_forward(
        features, proposals_boxes, proposals_labels, proposal_pairs,
        packed, POOL)

    jax.block_until_ready((x, rel_logits, obj_labels, rel_inds))

    n_pairs_total = sum(NUM_PAIRS)
    assert x.shape == (n_pairs_total, HIDDEN)
    assert rel_logits.shape == (n_pairs_total, NUM_REL_CLASSES)
    assert obj_labels.shape == (sum(NUM_PROPS),)
    assert rel_inds.shape == (n_pairs_total, 2)
    assert obj_logits is None

    # Pure-JAX reference of the MLP (mirrors the kernel's bf16 operand casts
    # and the (py, px, c)-major pooled layout / permuted w6 rows).
    pooled_ref, _ = union_box_roi_features(
        features, proposals_boxes, proposal_pairs, POOL)
    p32 = pooled_ref.astype(jnp.float32)
    w6_perm = _permute_w6_rows(params["w6"], C, POOL)

    def bf(a):
        return a.astype(jnp.bfloat16).astype(jnp.float32)

    h_ref = jnp.maximum(p32 @ bf(w6_perm) + params["b6"], 0.0)
    h_ref = jnp.maximum(bf(h_ref) @ bf(params["w7"]) + params["b7"], 0.0)
    logits_ref = bf(h_ref) @ bf(params["wp"]) + params["bp"]

    assert jnp.allclose(x.astype(jnp.float32), h_ref, rtol=5e-2, atol=5e-2)
    assert jnp.allclose(rel_logits, logits_ref, rtol=5e-2, atol=5e-2)

    print("KERNEL_OK")
</pallas_src>

<mosaic_0001>
module attributes {stable_mosaic.version = 11 : i64} {
  func.func @_rel_mlp_kernel(%arg0: i32, %arg1: i32, %arg2: memref<16x64xbf16, #tpu.memory_space<vmem>>, %arg3: memref<64x128xbf16, #tpu.memory_space<vmem>>, %arg4: memref<1x128xf32, #tpu.memory_space<vmem>>, %arg5: memref<1x128xf32, #tpu.memory_space<vmem>>, %arg6: memref<128x128xbf16, #tpu.memory_space<vmem>>, %arg7: memref<1x128xf32, #tpu.memory_space<vmem>>, %arg8: memref<128x128xbf16, #tpu.memory_space<any>>, %arg9: memref<16x128xbf16, #tpu.memory_space<vmem>>, %arg10: memref<16x128xf32, #tpu.memory_space<vmem>>, %arg11: memref<16x128xf32, #tpu.memory_space<vmem>>, %arg12: memref<2x128x128xbf16, #tpu.memory_space<vmem>>, %arg13: memref<2x!tpu.dma_semaphore, #tpu.memory_space<semaphore_mem>>) attributes {dimension_semantics = [#tpu.dimension_semantics<parallel>, #tpu.dimension_semantics<arbitrary>], iteration_bounds = array<i64: 1, 1>, scalar_prefetch = 0 : i64, scratch_operands = 3 : i64, tpu.core_type = #tpu.core_type<tc>, window_params = [{transform_indices = @transform_0, window_bounds = array<i64: 16, 64>}, {transform_indices = @transform_1, window_bounds = array<i64: 64, 128>}, {pipeline_mode = #tpu.pipeline_mode<synchronous>, transform_indices = @transform_2, window_bounds = array<i64: 1, 128>}, {pipeline_mode = #tpu.pipeline_mode<synchronous>, transform_indices = @transform_3, window_bounds = array<i64: 1, 128>}, {pipeline_mode = #tpu.pipeline_mode<synchronous>, transform_indices = @transform_4, window_bounds = array<i64: 128, 128>}, {pipeline_mode = #tpu.pipeline_mode<synchronous>, transform_indices = @transform_5, window_bounds = array<i64: 1, 128>}, {}, {transform_indices = @transform_7, window_bounds = array<i64: 16, 128>}, {transform_indices = @transform_8, window_bounds = array<i64: 16, 128>}]} {
    %c0_i32 = arith.constant 0 : i32
    %0 = arith.cmpi eq, %arg1, %c0_i32 : i32
    %1 = arith.extui %0 : i1 to i32
    %c0_i32_0 = arith.constant 0 : i32
    %2 = arith.cmpi ne, %1, %c0_i32_0 : i32
    scf.if %2 {
      %cst_10 = arith.constant 0.000000e+00 : f32
      %12 = vector.broadcast %cst_10 : f32 to vector<16x128xf32>
      %c0_11 = arith.constant 0 : index
      %c0_12 = arith.constant 0 : index
      %13 = vector.load %arg11[%c0_11, %c0_12] : memref<16x128xf32, #tpu.memory_space<vmem>>, vector<16x128xf32>
      tpu.vector_store %arg11[%c0_11, %c0_12], %12 {strides = array<i32>} : memref<16x128xf32, #tpu.memory_space<vmem>>, vector<16x128xf32>,
    } else {
    }
    %c0 = arith.constant 0 : index
    %c0_1 = arith.constant 0 : index
    %3 = vector.load %arg11[%c0, %c0_1] : memref<16x128xf32, #tpu.memory_space<vmem>>, vector<16x128xf32>
    %c0_2 = arith.constant 0 : index
    %c0_3 = arith.constant 0 : index
    %4 = vector.load %arg2[%c0_2, %c0_3] : memref<16x64xbf16, #tpu.memory_space<vmem>>, vector<16x64xbf16>
    %c0_4 = arith.constant 0 : index
    %c0_5 = arith.constant 0 : index
    %5 = vector.load %arg3[%c0_4, %c0_5] : memref<64x128xbf16, #tpu.memory_space<vmem>>, vector<64x128xbf16>
    %cst = arith.constant dense<0.000000e+00> : vector<16x128xf32>
    %6 = tpu.matmul %4, %5, %cst {dimension_numbers = #tpu.dot_dimension_numbers<[1], [0], [0], [1], [0, 0, 1, 1], [], []>} : vector<16x64xbf16>, vector<64x128xbf16>, vector<16x128xf32> -> vector<16x128xf32>
    %7 = arith.addf %3, %6 : vector<16x128xf32>
    %c0_6 = arith.constant 0 : index
    %c0_7 = arith.constant 0 : index
    %8 = vector.load %arg11[%c0_6, %c0_7] : memref<16x128xf32, #tpu.memory_space<vmem>>, vector<16x128xf32>
    tpu.vector_store %arg11[%c0_6, %c0_7], %7 {strides = array<i32>} : memref<16x128xf32, #tpu.memory_space<vmem>>, vector<16x128xf32>,
    %c0_i32_8 = arith.constant 0 : i32
    %9 = arith.cmpi eq, %arg1, %c0_i32_8 : i32
    %10 = arith.extui %9 : i1 to i32
    %c0_i32_9 = arith.constant 0 : i32
    %11 = arith.cmpi ne, %10, %c0_i32_9 : i32
    scf.if %11 {
      %c0_i32_10 = arith.constant 0 : i32
      %c0_i32_11 = arith.constant 0 : i32
      %c0_i32_12 = arith.constant 0 : i32
      %c0_i32_13 = arith.constant 0 : i32
      %12 = tpu.memref_slice %arg8[%c0_i32_12, %c0_i32_13] : memref<128x128xbf16, #tpu.memory_space<any>> -> memref<128x128xbf16, #tpu.memory_space<any>>
      %c0_i32_14 = arith.constant 0 : i32
      %c0_i32_15 = arith.constant 0 : i32
      %13 = tpu.memref_slice %arg12[%c0_i32_10, %c0_i32_14, %c0_i32_15] : memref<2x128x128xbf16, #tpu.memory_space<vmem>> -> memref<1x128x128xbf16, #tpu.memory_space<vmem>>
      %14 = tpu.memref_squeeze %13 : memref<1x128x128xbf16, #tpu.memory_space<vmem>> -> memref<128x128xbf16, #tpu.memory_space<vmem>>
      %15 = tpu.memref_slice %arg13[%c0_i32_11] : memref<2x!tpu.dma_semaphore, #tpu.memory_space<semaphore_mem>> -> memref<1x!tpu.dma_semaphore, #tpu.memory_space<semaphore_mem>>
      %16 = tpu.memref_squeeze %15 : memref<1x!tpu.dma_semaphore, #tpu.memory_space<semaphore_mem>> -> memref<!tpu.dma_semaphore, #tpu.memory_space<semaphore_mem>>
      tpu.enqueue_dma source(%12 : memref<128x128xbf16, #tpu.memory_space<any>>) target(%14 : memref<128x128xbf16, #tpu.memory_space<vmem>>) target_semaphore(%16 : memref<!tpu.dma_semaphore, #tpu.memory_space<semaphore_mem>>)
      %c0_16 = arith.constant 0 : index
      %c0_17 = arith.constant 0 : index
      %17 = vector.load %arg11[%c0_16, %c0_17] : memref<16x128xf32, #tpu.memory_space<vmem>>, vector<16x128xf32>
      %c0_18 = arith.constant 0 : index
      %c0_19 = arith.constant 0 : index
      %18 = vector.load %arg4[%c0_18, %c0_19] : memref<1x128xf32, #tpu.memory_space<vmem>>, vector<1x128xf32>
      %19 = vector.broadcast %18 : vector<1x128xf32> to vector<16x128xf32>
      %20 = arith.addf %17, %19 : vector<16x128xf32>
      %cst_20 = arith.constant 0.000000e+00 : f32
      %21 = vector.broadcast %cst_20 : f32 to vector<16x128xf32>
      %22 = arith.maximumf %20, %21 : vector<16x128xf32>
      %23 = arith.truncf %22 : vector<16x128xf32> to vector<16x128xbf16>
      %cst_21 = arith.constant 0.000000e+00 : f32
      %24 = vector.broadcast %cst_21 : f32 to vector<16x128xf32>
      %c0_22 = arith.constant 0 : index
      %c0_23 = arith.constant 0 : index
      %25 = vector.load %arg11[%c0_22, %c0_23] : memref<16x128xf32, #tpu.memory_space<vmem>>, vector<16x128xf32>
      tpu.vector_store %arg11[%c0_22, %c0_23], %24 {strides = array<i32>} : memref<16x128xf32, #tpu.memory_space<vmem>>, vector<16x128xf32>,
      %c0_i32_24 = arith.constant 0 : i32
      %c0_i32_25 = arith.constant 0 : i32
      %c0_i32_26 = arith.constant 0 : i32
      %c0_i32_27 = arith.constant 0 : i32
      %26 = tpu.memref_slice %arg8[%c0_i32_26, %c0_i32_27] : memref<128x128xbf16, #tpu.memory_space<any>> -> memref<128x128xbf16, #tpu.memory_space<any>>
      %c0_i32_28 = arith.constant 0 : i32
      %c0_i32_29 = arith.constant 0 : i32
      %27 = tpu.memref_slice %arg12[%c0_i32_24, %c0_i32_28, %c0_i32_29] : memref<2x128x128xbf16, #tpu.memory_space<vmem>> -> memref<1x128x128xbf16, #tpu.memory_space<vmem>>
      %28 = tpu.memref_squeeze %27 : memref<1x128x128xbf16, #tpu.memory_space<vmem>> -> memref<128x128xbf16, #tpu.memory_space<vmem>>
      %29 = tpu.memref_slice %arg13[%c0_i32_25] : memref<2x!tpu.dma_semaphore, #tpu.memory_space<semaphore_mem>> -> memref<1x!tpu.dma_semaphore, #tpu.memory_space<semaphore_mem>>
      %30 = tpu.memref_squeeze %29 : memref<1x!tpu.dma_semaphore, #tpu.memory_space<semaphore_mem>> -> memref<!tpu.dma_semaphore, #tpu.memory_space<semaphore_mem>>
      tpu.wait_dma2 semaphore(%30 : memref<!tpu.dma_semaphore, #tpu.memory_space<semaphore_mem>>) src(%26 : memref<128x128xbf16, #tpu.memory_space<any>>) dst(%28 : memref<128x128xbf16, #tpu.memory_space<vmem>>)
      %c0_30 = arith.constant 0 : index
      %c0_31 = arith.constant 0 : index
      %31 = vector.load %arg11[%c0_30, %c0_31] : memref<16x128xf32, #tpu.memory_space<vmem>>, vector<16x128xf32>
      %c0_32 = arith.constant 0 : index
      %c0_33 = arith.constant 0 : index
      %c0_34 = arith.constant 0 : index
      %32 = vector.load %arg12[%c0_32, %c0_33, %c0_34] : memref<2x128x128xbf16, #tpu.memory_space<vmem>>, vector<1x128x128xbf16>
      %33 = vector.shape_cast %32 : vector<1x128x128xbf16> to vector<128x128xbf16>
      %cst_35 = arith.constant dense<0.000000e+00> : vector<16x128xf32>
      %34 = tpu.matmul %23, %33, %cst_35 {dimension_numbers = #tpu.dot_dimension_numbers<[1], [0], [0], [1], [0, 0, 1, 1], [], []>} : vector<16x128xbf16>, vector<128x128xbf16>, vector<16x128xf32> -> vector<16x128xf32>
      %35 = arith.addf %31, %34 : vector<16x128xf32>
      %c0_36 = arith.constant 0 : index
      %c0_37 = arith.constant 0 : index
      %36 = vector.load %arg11[%c0_36, %c0_37] : memref<16x128xf32, #tpu.memory_space<vmem>>, vector<16x128xf32>
      tpu.vector_store %arg11[%c0_36, %c0_37], %35 {strides = array<i32>} : memref<16x128xf32, #tpu.memory_space<vmem>>, vector<16x128xf32>,
      %c0_38 = arith.constant 0 : index
      %c0_39 = arith.constant 0 : index
      %37 = vector.load %arg11[%c0_38, %c0_39] : memref<16x128xf32, #tpu.memory_space<vmem>>, vector<16x128xf32>
      %c0_40 = arith.constant 0 : index
      %c0_41 = arith.constant 0 : index
      %38 = vector.load %arg5[%c0_40, %c0_41] : memref<1x128xf32, #tpu.memory_space<vmem>>, vector<1x128xf32>
      %39 = vector.broadcast %38 : vector<1x128xf32> to vector<16x128xf32>
      %40 = arith.addf %37, %39 : vector<16x128xf32>
      %cst_42 = arith.constant 0.000000e+00 : f32
      %41 = vector.broadcast %cst_42 : f32 to vector<16x128xf32>
      %42 = arith.maximumf %40, %41 : vector<16x128xf32>
      %43 = arith.truncf %42 : vector<16x128xf32> to vector<16x128xbf16>
      %c0_43 = arith.constant 0 : index
      %c0_44 = arith.constant 0 : index
      %44 = vector.load %arg9[%c0_43, %c0_44] : memref<16x128xbf16, #tpu.memory_space<vmem>>, vector<16x128xbf16>
      tpu.vector_store %arg9[%c0_43, %c0_44], %43 {strides = array<i32>} : memref<16x128xbf16, #tpu.memory_space<vmem>>, vector<16x128xbf16>,
      %45 = arith.truncf %42 : vector<16x128xf32> to vector<16x128xbf16>
      %c0_45 = arith.constant 0 : index
      %c0_46 = arith.constant 0 : index
      %46 = vector.load %arg6[%c0_45, %c0_46] : memref<128x128xbf16, #tpu.memory_space<vmem>>, vector<128x128xbf16>
      %cst_47 = arith.constant dense<0.000000e+00> : vector<16x128xf32>
      %47 = tpu.matmul %45, %46, %cst_47 {dimension_numbers = #tpu.dot_dimension_numbers<[1], [0], [0], [1], [0, 0, 1, 1], [], []>} : vector<16x128xbf16>, vector<128x128xbf16>, vector<16x128xf32> -> vector<16x128xf32>
      %c0_48 = arith.constant 0 : index
      %c0_49 = arith.constant 0 : index
      %48 = vector.load %arg7[%c0_48, %c0_49] : memref<1x128xf32, #tpu.memory_space<vmem>>, vector<1x128xf32>
      %49 = vector.broadcast %48 : vector<1x128xf32> to vector<16x128xf32>
      %50 = arith.addf %47, %49 : vector<16x128xf32>
      %c0_50 = arith.constant 0 : index
      %c0_51 = arith.constant 0 : index
      %51 = vector.load %arg10[%c0_50, %c0_51] : memref<16x128xf32, #tpu.memory_space<vmem>>, vector<16x128xf32>
      tpu.vector_store %arg10[%c0_50, %c0_51], %50 {strides = array<i32>} : memref<16x128xf32, #tpu.memory_space<vmem>>, vector<16x128xf32>,
    } else {
    }
    return
  }
  func.func @transform_0(%arg0: i32, %arg1: i32) -> (i32, i32) {
    %c0_i32 = arith.constant 0 : i32
    return %arg0, %arg1 : i32, i32
  }
  func.func @transform_1(%arg0: i32, %arg1: i32) -> (i32, i32) {
    %c0_i32 = arith.constant 0 : i32
    %c0_i32_0 = arith.constant 0 : i32
    return %arg1, %c0_i32 : i32, i32
  }
  func.func @transform_2(%arg0: i32, %arg1: i32) -> (i32, i32) {
    %c0_i32 = arith.constant 0 : i32
    %c0_i32_0 = arith.constant 0 : i32
    %c0_i32_1 = arith.constant 0 : i32
    return %c0_i32, %c0_i32_0 : i32, i32
  }
  func.func @transform_3(%arg0: i32, %arg1: i32) -> (i32, i32) {
    %c0_i32 = arith.constant 0 : i32
    %c0_i32_0 = arith.constant 0 : i32
    %c0_i32_1 = arith.constant 0 : i32
    return %c0_i32, %c0_i32_0 : i32, i32
  }
  func.func @transform_4(%arg0: i32, %arg1: i32) -> (i32, i32) {
    %c0_i32 = arith.constant 0 : i32
    %c0_i32_0 = arith.constant 0 : i32
    %c0_i32_1 = arith.constant 0 : i32
    return %c0_i32, %c0_i32_0 : i32, i32
  }
  func.func @transform_5(%arg0: i32, %arg1: i32) -> (i32, i32) {
    %c0_i32 = arith.constant 0 : i32
    %c0_i32_0 = arith.constant 0 : i32
    %c0_i32_1 = arith.constant 0 : i32
    return %c0_i32, %c0_i32_0 : i32, i32
  }
  func.func @transform_7(%arg0: i32, %arg1: i32) -> (i32, i32) {
    %c0_i32 = arith.constant 0 : i32
    %c0_i32_0 = arith.constant 0 : i32
    return %arg0, %c0_i32 : i32, i32
  }
  func.func @transform_8(%arg0: i32, %arg1: i32) -> (i32, i32) {
    %c0_i32 = arith.constant 0 : i32
    %c0_i32_0 = arith.constant 0 : i32
    return %arg0, %c0_i32 : i32, i32
  }
}

</mosaic_0001>

<bundles_post_ra>
// kernel: tpu_custom_call.1
= control target key start
LH: loop header
LB: loop body
LE: loop exit
PB: predicated region body
PF: predicated region fallthrough
CT: control target
= control target key end

     0   :  { %14 = vsyncpa [#allocation6], 0  ;;  %s791_s0 = inlined_call_operand.hbm [shape: bf16[16,64], index: 0, kind: input, shape index: {}]   ;;  %s792_s1 = inlined_call_operand.hbm [shape: bf16[64,128], index: 1, kind: input, shape index: {}]   ;;  %s793_s2 = inlined_call_operand.vmem [shape: f32[1,128], index: 2, kind: input, shape index: {}]   ;;  %s794_s3 = inlined_call_operand.vmem [shape: f32[1,128], index: 3, kind: input, shape index: {}]   ;;  %s795_s4 = inlined_call_operand.hbm [shape: bf16[128,128], index: 4, kind: input, shape index: {}]   ;;  %s796_s5 = inlined_call_operand.vmem [shape: f32[1,128], index: 5, kind: input, shape index: {}]   ;;  %s797_s6 = inlined_call_operand.hbm [shape: bf16[128,128], index: 6, kind: input, shape index: {}]   ;;  %s798_s7 = inlined_call_operand.hbm [shape: bf16[16,128], index: 7, kind: output, shape index: {0}]   ;;  %s799_s8 = inlined_call_operand.hbm [shape: f32[16,128], index: 8, kind: output, shape index: {1}]  }
   0x1   :  { %15 = vsyncpa [#allocation9], 0 }
   0x2   :  { %16 = vsyncpa [#allocation7], 0 }
   0x3   :  { %17 = vsyncpa [#allocation13], 0  ;;  %s35_s29 = sshll.u32 %s792_s1, 4  ;;  %s697_s30 = smov [#allocation8]   ;;  %s36_s29 = int_to_ptr.hbm [resolvable:$true] %s35_s29 }
   0x4   :  { %s37_s9 = sshll.u32 %s697_s30, 4  ;;  %s22_s12 = sshll.u32 %s791_s0, 4  ;;  %s38_s9 = int_to_ptr.vmem [resolvable:$true] %s37_s9  ;;  %s23_s12 = int_to_ptr.hbm [resolvable:$true] %s22_s12 }
   0x5   :  { %s698_s13 = smov 64   ;;  %s699_s14 = smov 4  }
   0x6   :  { %43 = dma.hbm_to_vmem [thread:$0]  %s36_s29, 512, %s38_s9, [#allocation9], %s698_s13, %s698_s13, %s699_s14  }
   0x7   :  { %s700_s15 = smov [#allocation5]   ;;  %s52_s1 = sshll.u32 %s795_s4, 4  ;;  %s53_s1 = int_to_ptr.hbm [resolvable:$true] %s52_s1 }
   0x8   :  { %s24_s16 = sshll.u32 %s700_s15, 4  ;;  %s701_s0 = smov [#allocation10]   ;;  %s25_s16 = int_to_ptr.vmem [resolvable:$true] %s24_s16 }
   0x9   :  { %30 = dma.hbm_to_vmem [thread:$0]  %s23_s12, 128, %s25_s16, [#allocation6], %s698_s13, %s698_s13, %s699_s14  }
   0xa   :  { %s54_s19 = sshll.u32 %s701_s0, 4  ;;  %s55_s19 = int_to_ptr.vmem [resolvable:$true] %s54_s19 }
   0xb   :  { %60 = dma.hbm_to_vmem [thread:$0]  %s53_s1, 1024, %s55_s19, [#allocation9], %s698_s13, %s698_s13, %s699_s14  }
   0xc   :  { %687 = dma.done.wait [#allocation6], 128  }
   0xd   :  { %688 = vsyncadd [#allocation6], 4294967168 }
   0xe   :  { %689 = dma.done.wait [#allocation9], 1536  }
   0xf   :  { %690 = vsyncadd [#allocation9], 4294965760  ;;  %v508_v0 = vld [vmem:[#allocation8 + $0x18] sm:$0xff]  ;;  %v507_v1 = vld [vmem:[#allocation8 + $0x10] sm:$0xff]  ;;  %vm123_vm0 = vcmask 523264   ;;  %s155_s21 = sshll.u32 %s797_s6, 4  ;;  %s156_s21 = int_to_ptr.hbm [resolvable:$true] %s155_s21 }
  0x10   :  { %131 = vmatpush.bf16.msra.mxu0 %v508_v0  ;;  %v506_v2 = vld [vmem:[#allocation8 + $0x8] sm:$0xff]  ;;  %v505_v3 = vld [vmem:[#allocation8] sm:$0xff]  ;;  %v504_v4 = vld [vmem:[#allocation5] sm:$0xff]  ;;  %s702_s22 = smov [#allocation3]  }
  0x11   :  { %s157_s23 = sshll.u32 %s702_s22, 4  ;;  %v540_v6 = vld [vmem:[%s793_s2] ss:$0 sm:$0xff]  ;;  %s158_s23 = int_to_ptr.vmem [resolvable:$true] %s157_s23 }
  0x12   :  { %160 = dma.hbm_to_vmem [thread:$0]  %s156_s21, 1024, %s158_s23, [#allocation4] }
  0x14   :  { %132 = vmatpush.bf16.msra.mxu0 %v507_v1 }
  0x18   :  { %133 = vmatpush.bf16.msra.mxu0 %v506_v2 }
  0x1c   :  { %134 = vmatpush.bf16.msra.mxu0 %v505_v3 }
  0x1f   :  { %437 = vmatmul.msk.bf16.vlgmr.msra.gmra.mxu0 %vm123_vm0, %v504_v4 }
  0x9c   :  { %v136_v5 = vpop.f32.mrf.mxu0 }
  0x9d   :  { %v167_v7 = vadd.f32 %v540_v6, %v136_v5 }
  0x9f   :  { %v169_v10 = vmax.f32 %v167_v7, 0.0 }
  0xa4   :  { %v138_v8 = vpop.f32.mrf.mxu0 }
  0xa5   :  { %v168_v9 = vadd.f32 %v540_v6, %v138_v8 }
  0xa7   :  { %v170_v11 = vmax.f32 %v168_v9, 0.0 }
  0xa9   :  { %v171_v12 = vpack.c.bf16 %v170_v11, %v169_v10 }
  0xaa   :  { %691 = dma.done.wait [#allocation4], 1024 }
  0xab   :  { %692 = vsyncadd [#allocation4], 4294966272  ;;  %v516_v13 = vld [vmem:[#allocation3 + $0x38] sm:$0xff]  ;;  %v515_v14 = vld [vmem:[#allocation3 + $0x30] sm:$0xff]  ;;  %s703_s26 = smov [#allocation11]   ;;  %s704_s10 = smov [#allocation12]  }
  0xac   :  { %244 = vmatpush.bf16.msra.mxu1 %v516_v13  ;;  %v524_v15 = vld [vmem:[#allocation10 + $0x38] sm:$0xff]  ;;  %v523_v16 = vld [vmem:[#allocation10 + $0x30] sm:$0xff]  ;;  %v514_v17 = vld [vmem:[#allocation3 + $0x28] sm:$0xff]  ;;  %s370_s27 = sshll.u32 %s703_s26, 4  ;;  %s383_s11 = sshll.u32 %s704_s10, 4  ;;  %s371_s27 = int_to_ptr.vmem [resolvable:$true] %s370_s27  ;;  %s384_s11 = int_to_ptr.vmem [resolvable:$true] %s383_s11 }
  0xad   :  { %350 = vmatpush.bf16.msra.mxu2 %v524_v15  ;;  %v522_v18 = vld [vmem:[#allocation10 + $0x28] sm:$0xff]  ;;  %v513_v19 = vld [vmem:[#allocation3 + $0x20] sm:$0xff]  ;;  %v512_v20 = vld [vmem:[#allocation3 + $0x18] sm:$0xff]  ;;  %s385_s16 = sshll.u32 %s799_s8, 4  ;;  %s386_s16 = int_to_ptr.hbm [resolvable:$true] %s385_s16 }
  0xae   :  { %v511_v21 = vld [vmem:[#allocation3 + $0x10] sm:$0xff]  ;;  %v510_v22 = vld [vmem:[#allocation3 + $0x8] sm:$0xff]  ;;  %v509_v23 = vld [vmem:[#allocation3] sm:$0xff] }
  0xaf   :  { %v521_v24 = vld [vmem:[#allocation10 + $0x20] sm:$0xff]  ;;  %v520_v25 = vld [vmem:[#allocation10 + $0x18] sm:$0xff]  ;;  %v519_v26 = vld [vmem:[#allocation10 + $0x10] sm:$0xff] }
  0xb0   :  { %245 = vmatpush.bf16.msra.mxu1 %v515_v14  ;;  %v518_v27 = vld [vmem:[#allocation10 + $0x8] sm:$0xff]  ;;  %v517_v28 = vld [vmem:[#allocation10] sm:$0xff]  ;;  %v541_v29 = vld [vmem:[%s794_s3] ss:$0 sm:$0xff]  ;;  %s372_s3 = sshll.u32 %s798_s7, 4  ;;  %s705_s7 = smov 128   ;;  %s373_s3 = int_to_ptr.hbm [resolvable:$true] %s372_s3 }
  0xb1   :  { %351 = vmatpush.bf16.msra.mxu2 %v523_v16  ;;  %v542_v42 = vld [vmem:[%s796_s5] ss:$0 sm:$0xff] }
  0xb4   :  { %246 = vmatpush.bf16.msra.mxu1 %v514_v17 }
  0xb5   :  { %352 = vmatpush.bf16.msra.mxu2 %v522_v18 }
  0xb8   :  { %247 = vmatpush.bf16.msra.mxu1 %v513_v19 }
  0xb9   :  { %353 = vmatpush.bf16.msra.mxu2 %v521_v24 }
  0xbc   :  { %248 = vmatpush.bf16.msra.mxu1 %v512_v20 }
  0xbd   :  { %354 = vmatpush.bf16.msra.mxu2 %v520_v25 }
  0xc0   :  { %249 = vmatpush.bf16.msra.mxu1 %v511_v21 }
  0xc1   :  { %355 = vmatpush.bf16.msra.mxu2 %v519_v26 }
  0xc4   :  { %250 = vmatpush.bf16.msra.mxu1 %v510_v22 }
  0xc5   :  { %356 = vmatpush.bf16.msra.mxu2 %v518_v27 }
  0xc8   :  { %251 = vmatpush.bf16.msra.mxu1 %v509_v23 }
  0xc9   :  { %357 = vmatpush.bf16.msra.mxu2 %v517_v28 }
  0xcb   :  { %252 = vmatmul.bf16.vlgmr.msra.gmra.mxu1 %v171_v12 }
 0x148   :  { %v253_v30 = vpop.f32.mrf.mxu1 }
 0x149   :  { %v268_v31 = vadd.f32 %v541_v29, %v253_v30 }
 0x14b   :  { %v270_v32 = vmax.f32 %v268_v31, 0.0 }
 0x14d   :  { %v272_v35 = vpack.c.bf16 %v270_v32, %v270_v32 }
 0x14f   :  { %v298_v39 = vunpack.c.l.b16 %v272_v35 }
 0x150   :  { %v255_v33 = vpop.f32.mrf.mxu1 }
 0x151   :  { %v269_v34 = vadd.f32 %v541_v29, %v255_v33 }
 0x153   :  { %v271_v36 = vmax.f32 %v269_v34, 0.0 }
 0x155   :  { %v273_v37 = vpack.c.bf16 %v271_v36, %v271_v36  ;;  %v528_v38 = vpack.c.bf16 %v271_v36, %v270_v32 }
 0x157   :  { %529 = vst [vmem:[#allocation11] sm:$0xff] %v528_v38   ;;  %v299_v40 = vunpack.c.l.b16 %v273_v37 }
 0x158   :  { %378 = dma.vmem_to_hbm [thread:$0]  %s371_s27, 128, %s373_s3, [#allocation7], %s698_s13, %s698_s13, %s699_s14  }
 0x159   :  { %v300_v41 = vpack.c.b16 %v299_v40, %v298_v39  ;;  %s706_s13 = smov 8  }
 0x15b   :  { %358 = vmatmul.bf16.vlgmr.msra.gmra.mxu2 %v300_v41 }
 0x1de   :  { %v359_v43 = vpop.f32.mrf.mxu2 }
 0x1df   :  { %v360_v44 = vadd.f32 %v542_v42, %v359_v43 }
 0x1e1   :  { %364 = vst [vmem:[#allocation12] sm:$0xff] %v360_v44 }
 0x1e6   :  { %v361_v45 = vpop.f32.mrf.mxu2 }
 0x1e7   :  { %v362_v46 = vadd.f32 %v542_v42, %v361_v45 }
 0x1e9   :  { %365 = vst [vmem:[#allocation12 + $0x8] sm:$0xff] %v362_v46 }
 0x1ea   :  { %391 = dma.vmem_to_hbm [thread:$0]  %s384_s11, 256, %s386_s16, [#allocation13], %s705_s7, %s705_s7, %s706_s13  }
 0x1eb   :  { %693 = dma.done.wait [#allocation7], 128  }
 0x1ec   :  { %694 = vsyncadd [#allocation7], 4294967168 }
 0x1ed   :  { %695 = dma.done.wait [#allocation13], 256  }
 0x1ee   :  { %696 = vsyncadd [#allocation13], 4294967040 }
 0x1ef   :  { %400 = vsyncpa [#allocation6], 1 }
 0x1f0   :  { %401 = vsyncpa [#allocation9], 1 }
 0x1f1   :  { %402 = vsyncpa [#allocation7], 1 }
 0x1f2   :  { %403 = vsyncpa [#allocation13], 1 }
 0x1f3   :  { %404 = vsyncmov [#allocation4] }
 0x1f6   :  { %s405_s5 = vpop.sfrf %404 }
 0x1f7   :  { %p502_p0 = scmp.ne.s32.totalorder %s405_s5, 0 }
 0x1f9   :  { %409 = shalt.err (%p502_p0)  }
 0x1fa   :  { %411 = vsyncmov [#allocation4 + $0x1] }
 0x1fd   :  { %s412_s8 = vpop.sfrf %411 }
 0x1fe   :  { %p503_p1 = scmp.ne.s32.totalorder %s412_s8, 0 }
 0x200   :  { %416 = shalt.err (%p503_p1)  }

</bundles_post_ra>
